<compile_context>
chip_gen: v7x
topology: tpu7x:2x2x1
jax: 0.10.0
libtpu: 0.0.40
codegen_flags: <defaults>
</compile_context>

<pallas_src>
import functools
import math

import jax
import jax.numpy as jnp
from jax.experimental import pallas as pl
from jax.experimental.pallas import tpu as pltpu


def _round_up(x, m):
    return ((x + m - 1) // m) * m


def _self_attention_kernel(x_ref, w_ref, b_ref, o_ref, *, bb, n, r_pad,
                           matmul_dtype):
    """One grid step = bb complete point sets.

    x_ref: (bb*n, d)          flat rows of bb batch elements
    w_ref: (d, 3*r_pad)       fused [Wq*scale | Wk | Wv], zero-padded lanes
    b_ref: (1, 3*r_pad)       fused [bq*scale | bk | bv], zero-padded lanes
    o_ref: (bb*n, r_pad)      lane-dense output
    """
    x = x_ref[...].astype(matmul_dtype)
    w = w_ref[...].astype(matmul_dtype)

    # Fused QKV projection for the whole batch block: ONE MXU matmul,
    # f32 accumulation + bias.
    qkv = jnp.dot(x, w, preferred_element_type=jnp.float32) + b_ref[...]
    # (bb*n, 3*r_pad) -> (bb, n, 3*r_pad): n is sublane-aligned (8) and
    # r_pad lane-aligned (128), so this is a free retile, not a data shuffle.
    qkv = qkv.reshape(bb, n, 3 * r_pad)

    q = qkv[:, :, 0 * r_pad:1 * r_pad]   # 1/sqrt(r_dim) already folded in
    k = qkv[:, :, 1 * r_pad:2 * r_pad]
    v = qkv[:, :, 2 * r_pad:3 * r_pad]

    # Scores: batched Q @ K^T, contracting the feature axis directly (no
    # in-kernel transpose).  Padded feature lanes are exact zeros -> no effect.
    sdp = jnp.einsum("bqf,bkf->bqk", q.astype(matmul_dtype),
                     k.astype(matmul_dtype),
                     preferred_element_type=jnp.float32)       # (bb, n, n)

    # torch.nn.Softmax(dim=1) on each (N, N) score matrix == row softmax;
    # numerically stable form, f32 math, exact reciprocal (EUP otherwise idle).
    mx = jnp.max(sdp, axis=-1, keepdims=True)
    e = jnp.exp(sdp - mx)
    denom = jnp.sum(e, axis=-1, keepdims=True)
    p = e * pl.reciprocal(denom, approx=False)

    # r_i = W @ V -> lane-dense store; padded output columns stay exact zeros.
    r = jnp.einsum("bqk,bkf->bqf", p.astype(matmul_dtype),
                   v.astype(matmul_dtype),
                   preferred_element_type=jnp.float32)          # (bb, n, r_pad)
    o_ref[...] = r.reshape(bb * n, r_pad)


def make_fused_qkv_params(wq, bq, wk, bk, wv, bv):
    """Build the fused QKV parameters ONCE (they are module parameters).

    Pads each (D, r_dim) weight to 128 lanes, folds 1/sqrt(r_dim) into the Q
    projection (weight AND bias, so Q@K^T is pre-scaled exactly), and
    concatenates into one (D, 3*r_pad) weight and one (1, 3*r_pad) bias.
    Returns (w_fused, b_fused, r_dim).
    """
    d, r_dim = wq.shape
    r_pad = _round_up(r_dim, 128)
    pad = r_pad - r_dim
    scale = 1.0 / math.sqrt(r_dim)   # true r_dim, independent of padding

    def pad_w(w, s=1.0):
        return jnp.pad(w.astype(jnp.float32) * s, ((0, 0), (0, pad)))

    def pad_b(b, s=1.0):
        return jnp.pad(b.reshape(1, -1).astype(jnp.float32) * s,
                       ((0, 0), (0, pad)))

    w_fused = jnp.concatenate([pad_w(wq, scale), pad_w(wk), pad_w(wv)], axis=1)
    b_fused = jnp.concatenate([pad_b(bq, scale), pad_b(bk), pad_b(bv)], axis=1)
    return w_fused, b_fused, r_dim


def _default_grid_steps(batch):
    """2 grid steps on v7x (one per TensorCore), 1 on single-TC v5e/v6e."""
    try:
        kind = jax.devices()[0].device_kind.lower()
    except Exception:
        kind = ""
    two_core = ("v7" in kind) or ("7x" in kind)
    return 2 if (two_core and batch >= 2 and batch % 2 == 0) else 1


@functools.partial(jax.jit,
                   static_argnames=("r_dim", "grid_steps", "matmul_dtype"))
def self_attention_fused(x, w_fused, b_fused, *, r_dim, grid_steps,
                         matmul_dtype):
    """x: (B, N, D) f32; fused params from make_fused_qkv_params.
    Returns (B, N, r_dim) f32."""
    batch, n, d = x.shape
    r_pad = w_fused.shape[1] // 3
    assert batch % grid_steps == 0
    bb = batch // grid_steps

    # Flatten batch*points in the (jitted) wrapper so the kernel sees a plain
    # 2-D slab; per-element attention is recovered via a free in-kernel retile.
    x2 = x.reshape(batch * n, d)

    kernel = functools.partial(_self_attention_kernel, bb=bb, n=n, r_pad=r_pad,
                               matmul_dtype=matmul_dtype)

    out = pl.pallas_call(
        kernel,
        out_shape=jax.ShapeDtypeStruct((batch * n, r_pad), jnp.float32),
        grid_spec=pltpu.PrefetchScalarGridSpec(
            num_scalar_prefetch=0,
            grid=(grid_steps,),
            in_specs=[
                # bb complete point sets per grid step.
                pl.BlockSpec((bb * n, d), lambda g: (g, 0)),
                # Fused weight / bias shared across the (1-2 step) grid.
                pl.BlockSpec((d, 3 * r_pad), lambda g: (0, 0)),
                pl.BlockSpec((1, 3 * r_pad), lambda g: (0, 0)),
            ],
            out_specs=pl.BlockSpec((bb * n, r_pad), lambda g: (g, 0)),
        ),
        compiler_params=pltpu.CompilerParams(
            dimension_semantics=("parallel",)),   # splits 2 steps over v7x TCs
    )(x2, w_fused, b_fused)

    # TODO(synk): when this feeds a downstream Linear, return the padded
    # (.., 128) slab and fold this slice into that layer's weight instead.
    return out.reshape(batch, n, r_pad)[:, :, :r_dim]


def self_attention_batched(x, wq, bq, wk, bk, wv, bv, *,
                           matmul_dtype=jnp.bfloat16, grid_steps=None):
    """Module-style convenience: builds fused params per call (prefer calling
    make_fused_qkv_params once and self_attention_fused directly)."""
    w_fused, b_fused, r_dim = make_fused_qkv_params(wq, bq, wk, bk, wv, bv)
    if grid_steps is None:
        grid_steps = _default_grid_steps(x.shape[0])
    return self_attention_fused(x, w_fused, b_fused, r_dim=r_dim,
                                grid_steps=grid_steps,
                                matmul_dtype=matmul_dtype)


def self_attention(x, wq, bq, wk, bk, wv, bv, **kw):
    """Single-call form matching the PyTorch module: (N, input_dim) -> (N, r_dim)."""
    return self_attention_batched(x[None], wq, bq, wk, bk, wv, bv, **kw)[0]


def init_linear_params(key, in_dim, out_dim):
    """Mirror torch.nn.Linear's U(-1/sqrt(in), 1/sqrt(in)); weight stored
    pre-transposed as (in_dim, out_dim)."""
    kw, kb = jax.random.split(key)
    bound = 1.0 / math.sqrt(in_dim)
    w = jax.random.uniform(kw, (in_dim, out_dim), jnp.float32, -bound, bound)
    b = jax.random.uniform(kb, (1, out_dim), jnp.float32, -bound, bound)
    return w, b


def reference_self_attention(x, wq, bq, wk, bk, wv, bv):
    q = x @ wq + bq
    k = x @ wk + bk
    v = x @ wv + bv
    sdp = (q @ k.T) / math.sqrt(q.shape[-1])
    w = jax.nn.softmax(sdp, axis=1)
    return w @ v


if __name__ == "__main__":
    # Small shapes consistent with the ANP module: B independent point sets of
    # N points with input_dim features projected to r_dim.
    B, N, INPUT_DIM, R_DIM = 4, 8, 32, 32

    root = jax.random.PRNGKey(0)
    kx, kq, kk, kv = jax.random.split(root, 4)

    x_batched = jax.random.normal(kx, (B, N, INPUT_DIM), jnp.float32)
    wq, bq = init_linear_params(kq, INPUT_DIM, R_DIM)
    wk, bk = init_linear_params(kk, INPUT_DIM, R_DIM)
    wv, bv = init_linear_params(kv, INPUT_DIM, R_DIM)

    # Fused parameters built ONCE (hoisted out of the per-call path).
    w_fused, b_fused, r_dim = make_fused_qkv_params(wq, bq, wk, bk, wv, bv)
    grid_steps = _default_grid_steps(B)

    # Default path: bf16 MXU inputs, f32 accumulation / softmax.
    out_bf16 = self_attention_fused(x_batched, w_fused, b_fused, r_dim=r_dim,
                                    grid_steps=grid_steps,
                                    matmul_dtype=jnp.bfloat16)
    out_bf16 = jax.block_until_ready(out_bf16)
    assert out_bf16.shape == (B, N, R_DIM)

    # f32 path: should track the reference tightly (exact reciprocal).
    out_f32 = self_attention_fused(x_batched, w_fused, b_fused, r_dim=r_dim,
                                   grid_steps=grid_steps,
                                   matmul_dtype=jnp.float32)
    out_f32 = jax.block_until_ready(out_f32)

    for b in range(B):
        ref = reference_self_attention(x_batched[b], wq, bq, wk, bk, wv, bv)
        assert jnp.allclose(out_f32[b], ref, atol=1e-3, rtol=1e-3), \
            f"f32 mismatch vs reference at batch {b}"
        assert jnp.allclose(out_bf16[b], ref, atol=2e-2, rtol=2e-2), \
            f"bf16 mismatch vs reference at batch {b}"

    # Module-style single-call form (batch of 1 through the same kernel).
    out_single = self_attention(x_batched[0], wq, bq, wk, bk, wv, bv)
    out_single = jax.block_until_ready(out_single)
    ref0 = reference_self_attention(x_batched[0], wq, bq, wk, bk, wv, bv)
    assert out_single.shape == (N, R_DIM)
    assert jnp.allclose(out_single, ref0, atol=2e-2, rtol=2e-2), \
        "mismatch vs reference (single call)"

    print("KERNEL_OK")
</pallas_src>

<mosaic_0001>
module attributes {stable_mosaic.version = 11 : i64} {
  func.func @_self_attention_kernel(%arg0: i32, %arg1: memref<32x32xf32, #tpu.memory_space<vmem>>, %arg2: memref<32x384xf32, #tpu.memory_space<vmem>>, %arg3: memref<1x384xf32, #tpu.memory_space<vmem>>, %arg4: memref<32x128xf32, #tpu.memory_space<vmem>>) attributes {dimension_semantics = [#tpu.dimension_semantics<parallel>], iteration_bounds = array<i64: 1>, scalar_prefetch = 0 : i64, scratch_operands = 0 : i64, tpu.core_type = #tpu.core_type<tc>, window_params = [{transform_indices = @transform_0, window_bounds = array<i64: 32, 32>}, {pipeline_mode = #tpu.pipeline_mode<synchronous>, transform_indices = @transform_1, window_bounds = array<i64: 32, 384>}, {pipeline_mode = #tpu.pipeline_mode<synchronous>, transform_indices = @transform_2, window_bounds = array<i64: 1, 384>}, {transform_indices = @transform_3, window_bounds = array<i64: 32, 128>}]} {
    %c0 = arith.constant 0 : index
    %c0_0 = arith.constant 0 : index
    %0 = vector.load %arg1[%c0, %c0_0] : memref<32x32xf32, #tpu.memory_space<vmem>>, vector<32x32xf32>
    %1 = arith.truncf %0 : vector<32x32xf32> to vector<32x32xbf16>
    %c0_1 = arith.constant 0 : index
    %c0_2 = arith.constant 0 : index
    %2 = vector.load %arg2[%c0_1, %c0_2] : memref<32x384xf32, #tpu.memory_space<vmem>>, vector<32x384xf32>
    %3 = arith.truncf %2 : vector<32x384xf32> to vector<32x384xbf16>
    %cst = arith.constant dense<0.000000e+00> : vector<32x384xf32>
    %4 = tpu.matmul %1, %3, %cst {dimension_numbers = #tpu.dot_dimension_numbers<[1], [0], [0], [1], [0, 0, 1, 1], [], []>} : vector<32x32xbf16>, vector<32x384xbf16>, vector<32x384xf32> -> vector<32x384xf32>
    %c0_3 = arith.constant 0 : index
    %c0_4 = arith.constant 0 : index
    %5 = vector.load %arg3[%c0_3, %c0_4] : memref<1x384xf32, #tpu.memory_space<vmem>>, vector<1x384xf32>
    %6 = vector.broadcast %5 : vector<1x384xf32> to vector<32x384xf32>
    %7 = arith.addf %4, %6 : vector<32x384xf32>
    %8 = vector.shape_cast %7 : vector<32x384xf32> to vector<4x8x384xf32>
    %9 = vector.extract_strided_slice %8 {offsets = [0, 0, 0], sizes = [4, 8, 128], strides = [1, 1, 1]} : vector<4x8x384xf32> to vector<4x8x128xf32>
    %10 = vector.extract_strided_slice %8 {offsets = [0, 0, 128], sizes = [4, 8, 128], strides = [1, 1, 1]} : vector<4x8x384xf32> to vector<4x8x128xf32>
    %11 = vector.extract_strided_slice %8 {offsets = [0, 0, 256], sizes = [4, 8, 128], strides = [1, 1, 1]} : vector<4x8x384xf32> to vector<4x8x128xf32>
    %12 = arith.truncf %9 : vector<4x8x128xf32> to vector<4x8x128xbf16>
    %13 = arith.truncf %10 : vector<4x8x128xf32> to vector<4x8x128xbf16>
    "tpu.trace_start"() <{level = 10 : i32, message = "bqf,bkf->bqk"}> : () -> ()
    %cst_5 = arith.constant dense<0.000000e+00> : vector<4x8x8xf32>
    %14 = tpu.matmul %12, %13, %cst_5 {dimension_numbers = #tpu.dot_dimension_numbers<[2], [2], [1], [1], [0, 0, 0, 1, 1, 1], [0], [0]>} : vector<4x8x128xbf16>, vector<4x8x128xbf16>, vector<4x8x8xf32> -> vector<4x8x8xf32>
    "tpu.trace_stop"() : () -> ()
    %cst_6 = arith.constant dense<0xFF800000> : vector<4x8xf32>
    %15 = vector.multi_reduction <maximumf>, %14, %cst_6 [2] : vector<4x8x8xf32> to vector<4x8xf32>
    %16 = vector.shape_cast %15 : vector<4x8xf32> to vector<4x8x1xf32>
    %17 = vector.broadcast %16 : vector<4x8x1xf32> to vector<4x8x8xf32>
    %18 = arith.subf %14, %17 : vector<4x8x8xf32>
    %19 = math.exp %18 : vector<4x8x8xf32>
    %cst_7 = arith.constant dense<0.000000e+00> : vector<4x8xf32>
    %20 = vector.multi_reduction <add>, %19, %cst_7 [2] : vector<4x8x8xf32> to vector<4x8xf32>
    %21 = vector.shape_cast %20 : vector<4x8xf32> to vector<4x8x1xf32>
    %22 = tpu.reciprocal %21 : vector<4x8x1xf32> -> vector<4x8x1xf32>
    %23 = vector.broadcast %22 : vector<4x8x1xf32> to vector<4x8x8xf32>
    %24 = arith.mulf %19, %23 : vector<4x8x8xf32>
    %25 = arith.truncf %24 : vector<4x8x8xf32> to vector<4x8x8xbf16>
    %26 = arith.truncf %11 : vector<4x8x128xf32> to vector<4x8x128xbf16>
    "tpu.trace_start"() <{level = 10 : i32, message = "bqk,bkf->bqf"}> : () -> ()
    %cst_8 = arith.constant dense<0.000000e+00> : vector<4x8x128xf32>
    %27 = tpu.matmul %25, %26, %cst_8 {dimension_numbers = #tpu.dot_dimension_numbers<[2], [1], [1], [2], [0, 0, 0, 1, 1, 2], [0], [0]>} : vector<4x8x8xbf16>, vector<4x8x128xbf16>, vector<4x8x128xf32> -> vector<4x8x128xf32>
    "tpu.trace_stop"() : () -> ()
    %28 = vector.shape_cast %27 : vector<4x8x128xf32> to vector<32x128xf32>
    %c0_9 = arith.constant 0 : index
    %c0_10 = arith.constant 0 : index
    %29 = vector.load %arg4[%c0_9, %c0_10] : memref<32x128xf32, #tpu.memory_space<vmem>>, vector<32x128xf32>
    tpu.vector_store %arg4[%c0_9, %c0_10], %28 {strides = array<i32>} : memref<32x128xf32, #tpu.memory_space<vmem>>, vector<32x128xf32>,
    return
  }
  func.func @transform_0(%arg0: i32) -> (i32, i32) {
    %c0_i32 = arith.constant 0 : i32
    %c0_i32_0 = arith.constant 0 : i32
    return %arg0, %c0_i32 : i32, i32
  }
  func.func @transform_1(%arg0: i32) -> (i32, i32) {
    %c0_i32 = arith.constant 0 : i32
    %c0_i32_0 = arith.constant 0 : i32
    %c0_i32_1 = arith.constant 0 : i32
    return %c0_i32, %c0_i32_0 : i32, i32
  }
  func.func @transform_2(%arg0: i32) -> (i32, i32) {
    %c0_i32 = arith.constant 0 : i32
    %c0_i32_0 = arith.constant 0 : i32
    %c0_i32_1 = arith.constant 0 : i32
    return %c0_i32, %c0_i32_0 : i32, i32
  }
  func.func @transform_3(%arg0: i32) -> (i32, i32) {
    %c0_i32 = arith.constant 0 : i32
    %c0_i32_0 = arith.constant 0 : i32
    return %arg0, %c0_i32 : i32, i32
  }
}

</mosaic_0001>

<bundles_post_ra>
// kernel: self_attention_fused.1
= control target key start
LH: loop header
LB: loop body
LE: loop exit
PB: predicated region body
PF: predicated region fallthrough
CT: control target
= control target key end

     0   :  { %8 = vsyncpa [#allocation3], 0  ;;  %s929_s0 = inlined_call_operand.hbm [shape: f32[32,32], index: 0, kind: input, shape index: {}]   ;;  %s930_s1 = inlined_call_operand.hbm [shape: f32[32,384], index: 1, kind: input, shape index: {}]   ;;  %s931_s2 = inlined_call_operand.vmem [shape: f32[1,384], index: 2, kind: input, shape index: {}]   ;;  %s932_s3 = inlined_call_operand.hbm [shape: f32[32,128], index: 3, kind: output, shape index: {}]  }
   0x1   :  { %9 = vsyncpa [#allocation6], 0 }
   0x2   :  { %10 = vsyncpa [#allocation4], 0  ;;  %s804_s12 = smov [#allocation2]   ;;  %s732_s16 = scalar_lea.hbm %s929_s0, 512 }
   0x3   :  { %s16_s13 = sshll.u32 %s804_s12, 4  ;;  %p733_p0 = scmp.ne.s32.totalorder %s929_s0, %s732_s16  ;;  %s17_s13 = int_to_ptr.vmem [resolvable:$true] %s16_s13 }
   0x4   :  { %p736_p1 = scmp.lt.u32.totalorder %s732_s16, %s929_s0 }
   0x6   :  { %p738_p2 = pnand %p736_p1, %p733_p0 }
   0x8   :  { %741 = shalt.err (!%p738_p2)
}
   0x9   :  { %s742_s21 = scalar_lea.vmem %s17_s13, 512  ;;  %p747_p4 = scmp.lt.s32.totalorder %s17_s13, %s17_s13 }
   0xa   :  { %p743_p3 = scmp.ne.s32.totalorder %s17_s13, %s742_s21  ;;  %p748_p5 = scmp.lt.s32.totalorder %s742_s21, %s742_s21 }
   0xc   :  { %p749_p6 = por %p748_p5, %p747_p4 }
   0xe   :  { %p750_p7 = pnand %p749_p6, %p743_p3 }
  0x10   :  { %753 = shalt.err (!%p750_p7)
}
  0x11   :  { %s805_s22 = smov 128   ;;  %s806_s23 = smov 8  }
  0x12   :  { %22 = dma.hbm_to_vmem [thread:$0]  %s929_s0, 512, %s17_s13, [#allocation3], %s805_s22, %s805_s22, %s806_s23  }
  0x13   :  { %s807_s26 = smov [#allocation5]   ;;  %s754_s30 = scalar_lea.hbm %s930_s1, 1536 }
  0x14   :  { %s28_s27 = sshll.u32 %s807_s26, 4  ;;  %p755_p8 = scmp.ne.s32.totalorder %s930_s1, %s754_s30  ;;  %s29_s27 = int_to_ptr.vmem [resolvable:$true] %s28_s27 }
  0x15   :  { %p758_p9 = scmp.lt.u32.totalorder %s754_s30, %s930_s1 }
  0x17   :  { %p760_p10 = pnand %p758_p9, %p755_p8 }
  0x19   :  { %763 = shalt.err (!%p760_p10)
}
  0x1a   :  { %s764_s8 = scalar_lea.vmem %s29_s27, 1536  ;;  %p769_p12 = scmp.lt.s32.totalorder %s29_s27, %s29_s27 }
  0x1b   :  { %p765_p11 = scmp.ne.s32.totalorder %s29_s27, %s764_s8  ;;  %p770_p13 = scmp.lt.s32.totalorder %s764_s8, %s764_s8 }
  0x1d   :  { %p771_p0 = por %p770_p13, %p769_p12 }
  0x1f   :  { %p772_p1 = pnand %p771_p0, %p765_p11 }
  0x21   :  { %775 = shalt.err (!%p772_p1)
}
  0x22   :  { %s808_s0 = smov 384   ;;  %s809_s9 = smov 24  }
  0x23   :  { %34 = dma.hbm_to_vmem [thread:$0]  %s930_s1, 1536, %s29_s27, [#allocation6], %s808_s0, %s808_s0, %s809_s9  }
  0x24   :  { %798 = dma.done.wait [#allocation3], 512  }
  0x25   :  { %799 = vsyncadd [#allocation3], 4294966784 }
  0x26   :  { %800 = dma.done.wait [#allocation6], 1536  }
  0x27   :  { %801 = vsyncadd [#allocation6], 4294965760  ;;  %v810_v0 = vmov 0   ;;  %v51_v1 = vld [vmem:[#allocation5 + $0x8] sm:$0xff]  ;;  %v54_v2 = vld [vmem:[#allocation5 + $0x20] sm:$0xff]  ;;  %vm85_vm0 = vcmask 261120   ;;  %v70_v26 = vlaneseq }
  0x28   :  { %124 = vmatprep.mubr.bf16.mxu0 %v810_v0  ;;  %v50_v3 = vld [vmem:[#allocation5] sm:$0xff]  ;;  %v63_v4 = vpack.c.bf16 %v54_v2, %v51_v1  ;;  %v53_v5 = vld [vmem:[#allocation5 + $0x18] sm:$0xff]  ;;  %v60_v7 = vld [vmem:[#allocation5 + $0x50] sm:$0xff]  ;;  %v811_v25 = vmov 0.0   ;;  %vm812_vm1 = vmmov 0   ;;  %vm418_vm2 = vcmask 1043456  }
  0x29   :  { %v57_v6 = vld [vmem:[#allocation5 + $0x38] sm:$0xff]  ;;  %v62_v8 = vpack.c.bf16 %v53_v5, %v50_v3  ;;  %v56_v10 = vld [vmem:[#allocation5 + $0x30] sm:$0xff]  ;;  %v59_v11 = vld [vmem:[#allocation5 + $0x48] sm:$0xff]  ;;  %v71_v27 = vshrl.u32 %v70_v26, 7  ;;  %vm362_vm3 = vcmask 64512  }
  0x2a   :  { %v66_v9 = vpack.c.bf16 %v60_v7, %v57_v6  ;;  %v44_v12 = vld [vmem:[#allocation2] sm:$0xff]  ;;  %92 = vmatprep.subr.bf16.mxu0 %v63_v4  ;;  %v45_v13 = vld [vmem:[#allocation2 + $0x8] sm:$0xff]  ;;  %v65_v14 = vpack.c.bf16 %v59_v11, %v56_v10  ;;  %v52_v16 = vld [vmem:[#allocation5 + $0x10] sm:$0xff] }
  0x2b   :  { %93 = vmatpush1.bf16.msra.mxu0 %v62_v8  ;;  %v48_v15 = vpack.c.bf16 %v45_v13, %v44_v12  ;;  %v55_v17 = vld [vmem:[#allocation5 + $0x28] sm:$0xff]  ;;  %v58_v18 = vld [vmem:[#allocation5 + $0x40] sm:$0xff]  ;;  %v61_v20 = vld [vmem:[#allocation5 + $0x58] sm:$0xff]  ;;  %v76_v28 = vsub.s32 1, %v71_v27  ;;  %v80_v30 = vsub.s32 2, %v71_v27  ;;  %v72_v32 = vsub.s32 0, %v71_v27 }
  0x2c   :  { %94 = vmatprep.subr.bf16.mxu0 %v66_v9  ;;  %v64_v19 = vpack.c.bf16 %v55_v17, %v52_v16  ;;  %v67_v21 = vpack.c.bf16 %v61_v20, %v58_v18  ;;  %v46_v22 = vld [vmem:[#allocation2 + $0x10] sm:$0xff]  ;;  %v47_v23 = vld [vmem:[#allocation2 + $0x18] sm:$0xff]  ;;  %v68_v29 = vld [vmem:[%s931_s2] sm:$0x7]  ;;  %s813_s2 = smov [#allocation7]  }
  0x2d   :  { %654 = vmatprep.mubr.msk.bf16.mxu1 %vm85_vm0, %v48_v15  ;;  %v49_v24 = vpack.c.bf16 %v47_v23, %v46_v22  ;;  %v77_v31 = vrot.slane %v68_v29, %v76_v28  ;;  %v81_v35 = vrot.slane %v68_v29, %v80_v30  ;;  %v73_v38 = vrot.slane %v68_v29, %v72_v32  ;;  %s609_s13 = sshll.u32 %s813_s2, 4  ;;  %s610_s13 = int_to_ptr.vmem [resolvable:$true] %s609_s13 }
  0x2e   :  { %650 = vmatprep.subr.bf16.mxu1 %v64_v19  ;;  %s776_s14 = scalar_lea.vmem %s610_s13, 512  ;;  %p781_p3 = scmp.lt.s32.totalorder %s610_s13, %s610_s13 }
  0x2f   :  { %95 = vmatpush1.bf16.msra.mxu0 %v65_v14  ;;  %651 = vmatpush3.bf16.msra.mxu1 %v64_v19  ;;  %p777_p2 = scmp.ne.s32.totalorder %s610_s13, %s776_s14  ;;  %p782_p4 = scmp.lt.s32.totalorder %s776_s14, %s776_s14 }
  0x30   :  { %652 = vmatprep.subr.bf16.mxu1 %v67_v21  ;;  %664 = vmatprep.subr.bf16.mxu0 %v811_v25 }
  0x31   :  { %p783_p5 = por %p782_p4, %p781_p3 }
  0x32   :  { %622 = vmatmul.mubr.msk.bf16.vlgmr.msra.gmra.mrb[0].mxu0 %vm85_vm0, %v48_v15 }
  0x33   :  { %134 = vmatprep.mubr.bf16.mxu0 %v810_v0  ;;  %653 = vmatpush3.bf16.msra.mxu1 %v67_v21  ;;  %p784_p6 = pnand %p783_p5, %p777_p2 }
  0x34   :  { %658 = vmatprep.subr.bf16.mxu1 %v811_v25 }
  0x36   :  { %655 = vmatmul.mubr.msk.bf16.vlgmr.msra.gmra.mrb[0].mxu1 %vm85_vm0, %v49_v24 }
  0x37   :  { %660 = vmatprep.mubr.msk.bf16.mxu1 %vm812_vm1, %v811_v25 }
  0x3a   :  { %623 = vmatmul.mubr.msk.bf16.gmra.mrb[4].mxu0 %vm85_vm0, %v49_v24 }
  0x3b   :  { %666 = vmatprep.mubr.msk.bf16.mxu0 %vm812_vm1, %v811_v25 }
 0x105   :  { %v126_v33 = vpop.f32.mrb[0].mxu0 }
 0x106   :  { %v128_v34 = vpop.f32.mrb[1].mxu0  ;;  %v127_v47 = vadd.f32 %v126_v33, %v73_v38 }
 0x107   :  { %v129_v36 = vadd.f32 %v128_v34, %v77_v31  ;;  %v130_v37 = vpop.f32.mrb[2].mxu0 }
 0x108   :  { %v132_v39 = vpop.f32.mrb[3].mxu0  ;;  %v131_v52 = vadd.f32 %v130_v37, %v73_v38  ;;  %v194_v58 = vpack.c.bf16 %v127_v47, %v127_v47 }
 0x109   :  { %v198_v40 = vpack.c.bf16 %v129_v36, %v129_v36  ;;  %v133_v41 = vadd.f32 %v132_v39, %v77_v31  ;;  %v656_v42 = vpop.f32.mrb[0].mxu1 }
 0x10a   :  { %v188_v43 = vadd.f32 %v656_v42, %v81_v35  ;;  %v179_v44 = vpop.f32.mrb[1].mxu1  ;;  %v195_v0 = vpack.c.bf16 %v131_v52, %v131_v52 }
 0x10b   :  { %v199_v45 = vpack.c.bf16 %v133_v41, %v133_v41  ;;  %659 = vmatpush3.bf16.xpose.msra.mxu1 %v198_v40  ;;  %v657_v46 = vpop.f32.mrb[2].mxu1  ;;  %v180_v60 = vadd.f32 %v179_v44, %v81_v35 }
 0x10c   :  { %670 = vmatprep.subr.bf16.mxu1 %v811_v25  ;;  %v413_v48 = vpack.c.bf16 %v188_v43, %v188_v43  ;;  %v191_v49 = vadd.f32 %v657_v46, %v81_v35  ;;  %v182_v50 = vpop.f32.mrb[3].mxu1 }
 0x10d   :  { %v136_v51 = vpop.f32.mrb[4].mxu0  ;;  %665 = vmatpush3.bf16.xpose.msra.mxu0 %v199_v45  ;;  %v183_v1 = vadd.f32 %v182_v50, %v81_v35  ;;  %v411_v4 = vpack.c.bf16 %v180_v60, %v180_v60 }
 0x10e   :  { %v138_v53 = vpop.f32.mrb[5].mxu0  ;;  %676 = vmatprep.subr.bf16.mxu0 %v811_v25  ;;  %v877_v54 = vsel %vm418_vm2, %v413_v48, 0  ;;  %v414_v55 = vpack.c.bf16 %v191_v49, %v191_v49  ;;  %v137_v3 = vadd.f32 %v136_v51, %v73_v38 }
 0x10f   :  { %v139_v56 = vadd.f32 %v138_v53, %v77_v31  ;;  %v140_v57 = vpop.f32.mrb[6].mxu0  ;;  %v412_v6 = vpack.c.bf16 %v183_v1, %v183_v1  ;;  %v420_v8 = vsel %vm418_vm2, %v411_v4, 0 }
 0x110   :  { %v142_v59 = vpop.f32.mrb[7].mxu0  ;;  %v880_v61 = vsel %vm418_vm2, %v414_v55, 0  ;;  %v141_v5 = vadd.f32 %v140_v57, %v73_v38  ;;  %v196_v7 = vpack.c.bf16 %v137_v3, %v137_v3 }
 0x111   :  { %v200_v62 = vpack.c.bf16 %v139_v56, %v139_v56  ;;  %v143_v63 = vadd.f32 %v142_v59, %v77_v31  ;;  %v466_v10 = vsel %vm418_vm2, %v412_v6, 0 }
 0x112   :  { %661 = vmatmul.mubr.bf16.vlgmr.msra.gmra.mrb[4].mxu1 %v194_v58  ;;  %v197_v9 = vpack.c.bf16 %v141_v5, %v141_v5 }
 0x113   :  { %v201_v2 = vpack.c.bf16 %v143_v63, %v143_v63  ;;  %671 = vmatpush3.bf16.xpose.msra.mxu1 %v200_v62  ;;  %672 = vmatprep.mubr.msk.bf16.mxu1 %vm812_vm1, %v811_v25 }
 0x114   :  { %667 = vmatmul.mubr.bf16.vlgmr.msra.gmra.mrb[8].mxu0 %v195_v0  ;;  %682 = vmatprep.subr.bf16.mxu1 %v811_v25 }
 0x115   :  { %677 = vmatpush3.bf16.xpose.msra.mxu0 %v201_v2  ;;  %678 = vmatprep.mubr.msk.bf16.mxu0 %vm812_vm1, %v811_v25 }
 0x116   :  { %688 = vmatprep.subr.bf16.mxu0 %v811_v25 }
 0x11a   :  { %673 = vmatmul.mubr.bf16.vlgmr.msra.gmra.mrb[8].mxu1 %v196_v7 }
 0x11b   :  { %683 = vmatpush3.bf16.msra.mxu1 %v420_v8  ;;  %684 = vmatprep.mubr.msk.bf16.mxu1 %vm812_vm1, %v811_v25 }
 0x11c   :  { %679 = vmatmul.mubr.bf16.vlgmr.msra.gmra.mrb[12].mxu0 %v197_v9  ;;  %694 = vmatprep.subr.bf16.mxu1 %v811_v25 }
 0x11d   :  { %689 = vmatpush3.bf16.msra.mxu0 %v466_v10  ;;  %690 = vmatprep.mubr.msk.bf16.mxu0 %vm812_vm1, %v811_v25 }
 0x11e   :  { %700 = vmatprep.subr.bf16.mxu0 %v811_v25 }
 0x1e5   :  { %v236_v11 = vpop.f32.mrb[4].mxu1 }
 0x1e6   :  { %v662_v12 = vpop.f32.mrb[5].mxu1  ;;  %v363_v13 = vsel %vm362_vm3, %v236_v11, -inf }
 0x1e7   :  { %v276_v14 = vpop.f32.mrb[8].mxu0  ;;  %364 = vmax.xlane.f32.xlu0 %v363_v13  ;;  %v239_v15 = vpop.f32.mrb[6].mxu1 }
 0x1e8   :  { %v663_v16 = vpop.f32.mrb[7].mxu1  ;;  %v668_v17 = vpop.f32.mrb[9].mxu0  ;;  %v366_v20 = vsel %vm362_vm3, %v276_v14, -inf }
 0x1e9   :  { %v279_v18 = vpop.f32.mrb[10].mxu0 }
 0x1ea   :  { %v669_v19 = vpop.f32.mrb[11].mxu0 }
 0x1eb   :  { %367 = vmax.xlane.f32.xlu0 %v366_v20 }
 0x1ed   :  { %v316_v21 = vpop.f32.mrb[8].mxu1 }
 0x1ee   :  { %v674_v22 = vpop.f32.mrb[9].mxu1  ;;  %v369_v23 = vsel %vm362_vm3, %v316_v21, -inf }
 0x1ef   :  { %v356_v24 = vpop.f32.mrb[12].mxu0  ;;  %370 = vmax.xlane.f32.xlu1 %v369_v23  ;;  %v319_v26 = vpop.f32.mrb[10].mxu1 }
 0x1f0   :  { %v675_v27 = vpop.f32.mrb[11].mxu1  ;;  %v680_v28 = vpop.f32.mrb[13].mxu0  ;;  %v372_v31 = vsel %vm362_vm3, %v356_v24, -inf }
 0x1f1   :  { %v359_v29 = vpop.f32.mrb[14].mxu0 }
 0x1f2   :  { %v681_v30 = vpop.f32.mrb[15].mxu0 }
 0x1f3   :  { %373 = vmax.xlane.f32.xlu1 %v372_v31 }
 0x274   :  { %v365_v32 = vpop.xlane.xlu0 %364 }
 0x275   :  { %v375_v33 = vsub.f32 %v236_v11, %v365_v32 }
 0x277   :  { %v379_v34 = vmul.f32 1.442695, %v375_v33 }
 0x278   :  { %v368_v35 = vpop.xlane.xlu0 %367 }
 0x279   :  { %716 = vpow2.f32 %v379_v34  ;;  %v376_v36 = vsub.f32 %v276_v14, %v368_v35 }
 0x27b   :  { %v381_v37 = vmul.f32 1.442695, %v376_v36 }
 0x27c   :  { %v371_v38 = vpop.xlane.xlu1 %370 }
 0x27d   :  { %718 = vpow2.f32 %v381_v37  ;;  %v377_v39 = vsub.f32 %v316_v21, %v371_v38 }
 0x27f   :  { %v383_v40 = vmul.f32 1.442695, %v377_v39 }
 0x280   :  { %v374_v41 = vpop.xlane.xlu1 %373 }
 0x281   :  { %720 = vpow2.f32 %v383_v40  ;;  %v378_v42 = vsub.f32 %v356_v24, %v374_v41 }
 0x283   :  { %v717_v43 = vpop.eup %716  ;;  %v385_v44 = vmul.f32 1.442695, %v378_v42 }
 0x284   :  { %v387_v45 = vsel %vm362_vm3, %v717_v43, 0.0 }
 0x285   :  { %722 = vpow2.f32 %v385_v44  ;;  %388 = vadd.xlane.f32.xlu0 %v387_v45 }
 0x287   :  { %v719_v46 = vpop.eup %718 }
 0x288   :  { %v390_v47 = vsel %vm362_vm3, %v719_v46, 0.0 }
 0x289   :  { %391 = vadd.xlane.f32.xlu1 %v390_v47 }
 0x28b   :  { %v721_v48 = vpop.eup %720 }
 0x28c   :  { %v393_v49 = vsel %vm362_vm3, %v721_v48, 0.0 }
 0x28d   :  { %394 = vadd.xlane.f32.xlu0 %v393_v49 }
 0x28f   :  { %v723_v50 = vpop.eup %722 }
 0x290   :  { %v396_v51 = vsel %vm362_vm3, %v723_v50, 0.0 }
 0x291   :  { %397 = vadd.xlane.f32.xlu1 %v396_v51 }
 0x312   :  { %v389_v52 = vpop.xlane.xlu0 %388 }
 0x313   :  { %724 = vrcp.f32 %v389_v52 }
 0x316   :  { %v392_v53 = vpop.xlane.xlu1 %391 }
 0x317   :  { %726 = vrcp.f32 %v392_v53 }
 0x31a   :  { %v395_v55 = vpop.xlane.xlu0 %394 }
 0x31b   :  { %728 = vrcp.f32 %v395_v55 }
 0x31d   :  { %v725_v56 = vpop.eup %724 }
 0x31e   :  { %v403_v57 = vmul.f32 %v725_v56, %v717_v43  ;;  %v398_v58 = vpop.xlane.xlu1 %397 }
 0x31f   :  { %730 = vrcp.f32 %v398_v58 }
 0x320   :  { %v407_v59 = vpack.c.bf16 %v403_v57, %v403_v57 }
 0x321   :  { %v727_v60 = vpop.eup %726 }
 0x322   :  { %v404_v62 = vmul.f32 %v727_v60, %v719_v46  ;;  %685 = vmatmul.mubr.msk.bf16.vlgmr.msra.gmra.mrb[12].mxu1 %vm362_vm3, %v407_v59 }
 0x323   :  { %695 = vmatpush3.bf16.msra.mxu1 %v877_v54  ;;  %696 = vmatprep.mubr.msk.bf16.mxu1 %vm812_vm1, %v811_v25 }
 0x324   :  { %v408_v63 = vpack.c.bf16 %v404_v62, %v404_v62 }
 0x325   :  { %v729_v0 = vpop.eup %728 }
 0x326   :  { %v405_v1 = vmul.f32 %v729_v0, %v721_v48  ;;  %691 = vmatmul.mubr.msk.bf16.vlgmr.msra.gmra.mrb[16].mxu0 %vm362_vm3, %v408_v63 }
 0x327   :  { %701 = vmatpush3.bf16.msra.mxu0 %v880_v61  ;;  %702 = vmatprep.mubr.msk.bf16.mxu0 %vm812_vm1, %v811_v25 }
 0x328   :  { %v409_v2 = vpack.c.bf16 %v405_v1, %v405_v1 }
 0x329   :  { %v731_v3 = vpop.eup %730 }
 0x32a   :  { %v406_v4 = vmul.f32 %v731_v3, %v723_v50  ;;  %697 = vmatmul.mubr.msk.bf16.vlgmr.msra.gmra.mrb[16].mxu1 %vm362_vm3, %v409_v2 }
 0x32c   :  { %v410_v5 = vpack.c.bf16 %v406_v4, %v406_v4 }
 0x32e   :  { %703 = vmatmul.mubr.msk.bf16.vlgmr.msra.gmra.mrb[20].mxu0 %vm362_vm3, %v410_v5 }
 0x3f5   :  { %v456_v54 = vpop.f32.mrb[12].mxu1 }
 0x3f6   :  { %600 = vst [vmem:[#allocation7] sm:$0xff] %v456_v54  ;;  %v686_v6 = vpop.f32.mrb[13].mxu1 }
 0x3f7   :  { %v459_v7 = vpop.f32.mrb[14].mxu1 }
 0x3f8   :  { %v687_v8 = vpop.f32.mrb[15].mxu1 }
 0x3f9   :  { %v502_v9 = vpop.f32.mrb[16].mxu0 }
 0x3fa   :  { %601 = vst [vmem:[#allocation7 + $0x8] sm:$0xff] %v502_v9  ;;  %v692_v10 = vpop.f32.mrb[17].mxu0 }
 0x3fb   :  { %v505_v61 = vpop.f32.mrb[18].mxu0 }
 0x3fc   :  { %v693_v11 = vpop.f32.mrb[19].mxu0 }
 0x3fd   :  { %v548_v12 = vpop.f32.mrb[16].mxu1 }
 0x3fe   :  { %602 = vst [vmem:[#allocation7 + $0x10] sm:$0xff] %v548_v12  ;;  %v698_v25 = vpop.f32.mrb[17].mxu1 }
 0x3ff   :  { %v551_v13 = vpop.f32.mrb[18].mxu1 }
 0x400   :  { %v699_v14 = vpop.f32.mrb[19].mxu1 }
 0x401   :  { %v594_v15 = vpop.f32.mrb[20].mxu0 }
 0x402   :  { %603 = vst [vmem:[#allocation7 + $0x18] sm:$0xff] %v594_v15  ;;  %v704_v16 = vpop.f32.mrb[21].mxu0 }
 0x403   :  { %v597_v17 = vpop.f32.mrb[22].mxu0 }
 0x404   :  { %787 = shalt.err (!%p784_p6)
}
 0x405   :  { %s788_s17 = scalar_lea.hbm %s932_s3, 512 }
 0x406   :  { %p789_p7 = scmp.ne.s32.totalorder %s932_s3, %s788_s17  ;;  %p792_p8 = scmp.lt.u32.totalorder %s788_s17, %s932_s3 }
 0x408   :  { %p794_p9 = pnand %p792_p8, %p789_p7 }
 0x40a   :  { %797 = shalt.err (!%p794_p9)
}
 0x40b   :  { %615 = dma.vmem_to_hbm [thread:$0]  %s610_s13, 512, %s932_s3, [#allocation4], %s805_s22, %s805_s22, %s806_s23   ;;  %v705_v18 = vpop.f32.mrb[23].mxu0 }
 0x40c   :  { %802 = dma.done.wait [#allocation4], 512  }
 0x40d   :  { %803 = vsyncadd [#allocation4], 4294966784 }
 0x40e   :  { %619 = vsyncpa [#allocation3], 1 }
 0x40f   :  { %620 = vsyncpa [#allocation6], 1 }
 0x410   :  { %621 = vsyncpa [#allocation4], 1 }

</bundles_post_ra>
